<compile_context>
chip_gen: v7x
topology: tpu7x:2x2x1
jax: 0.10.0
libtpu: 0.0.40
codegen_flags: <defaults>
</compile_context>

<pallas_src>
import functools

import jax
import jax.numpy as jnp
from jax import lax
from jax.experimental import pallas as pl
from jax.experimental.pallas import tpu as pltpu


# ----------------------------- Pallas kernel -------------------------------

def fused_fbc_kernel(p_ref, w_ref, b_ref, fcw_ref, fcb_ref, o_ref, acc_ref, *,
                     inv_p):
    """Fused conv(im2col-matmul) + bias + ReLU + global-avg-pool + classifier.

    p_ref   : (1, row_tile, Kp)   im2col patch tile for batch b (Kp = padded K)
    w_ref   : (Kp, C_out)         conv weight, transposed, K-padded
    b_ref   : (1, C_out)          conv bias (f32)
    fcw_ref : (C_out, OUT_PAD)    classifier weight^T, lane-padded
    fcb_ref : (1, OUT_PAD)        classifier bias, lane-padded (f32)
    o_ref   : (1, 1, OUT_PAD)     logits slab for batch b
    acc_ref : (1, C_out) f32      per-batch pooled-sum accumulator (scratch)
    """
    r = pl.program_id(1)

    @pl.when(r == 0)
    def _init():
        acc_ref[...] = jnp.zeros_like(acc_ref)

    # conv as matmul on this row tile (MXU, f32 accumulation).
    y = jnp.dot(p_ref[0], w_ref[...], preferred_element_type=jnp.float32)
    y = jnp.maximum(y + b_ref[...], 0.0)                      # bias + ReLU (f32)

    # Pooling partial sum via MXU ones-row matmul (keeps the XLU idle).
    ones_row = jnp.ones((1, y.shape[0]), dtype=jnp.float32)
    acc_ref[...] += jnp.dot(ones_row, y, preferred_element_type=jnp.float32)

    @pl.when(r == pl.num_programs(1) - 1)
    def _finalize():
        feats = acc_ref[...] * inv_p                          # global average
        logits = jnp.dot(feats, fcw_ref[...],
                         preferred_element_type=jnp.float32) + fcb_ref[...]
        o_ref[0] = logits.astype(o_ref.dtype)


# ------------------------------- glue (JAX) --------------------------------

def _round_up(x, m):
    return ((x + m - 1) // m) * m


def _pick_row_tile(p, kp, itemsize, vmem_budget_bytes=8 * 1024 * 1024):
    """Largest sublane-aligned divisor of P whose double-buffered block fits budget."""
    sub = 8 if itemsize >= 4 else 16            # bf16 packs 2 rows / sublane
    cap = max(sub, vmem_budget_bytes // (2 * kp * itemsize))
    best = None
    t = sub
    while t <= p:
        if p % t == 0 and t <= cap:
            best = t
        t += sub
    return best if best is not None else p       # full-dim block is always legal


def im2col_nchw(x_nchw, kh=3, kw=3, pad=1):
    """(N, C, H, W) -> (N, H*W, C*kh*kw), inner feature order (c, kh, kw)."""
    n, c, h, w = x_nchw.shape
    xp = jnp.pad(x_nchw, ((0, 0), (0, 0), (pad, pad), (pad, pad)))
    taps = []
    for i in range(kh):
        for j in range(kw):
            taps.append(xp[:, :, i:i + h, j:j + w])        # (N, C, H, W)
    p = jnp.stack(taps, axis=2)                            # (N, C, kh*kw, H, W)
    p = p.transpose(0, 3, 4, 1, 2)                         # (N, H, W, C, kh*kw)
    return p.reshape(n, h * w, c * kh * kw)


def fbc_forward(x_nchw, conv_w, conv_b, fc_w, fc_b, *,
                compute_dtype=jnp.float32, row_tile=None):
    """FBC forward: conv+ReLU+global-avgpool -> flatten -> classifier (one kernel)."""
    n, c_in, h, w = x_nchw.shape
    c_out = conv_w.shape[0]
    n_cls = fc_w.shape[0]
    p = h * w
    k = c_in * 9
    kp = _round_up(k, 8)                        # pad contraction dim to x8
    out_pad = _round_up(n_cls, 128)             # lane-dense output slab

    # im2col patches (N, P, K), K-padded, cast to MXU input dtype.
    patches = im2col_nchw(x_nchw)
    patches = jnp.pad(patches, ((0, 0), (0, 0), (0, kp - k))).astype(compute_dtype)

    w_t = conv_w.reshape(c_out, k).T                                     # (K, C_out)
    w_t = jnp.pad(w_t, ((0, kp - k), (0, 0))).astype(compute_dtype)      # (Kp, C_out)
    b2d = conv_b.reshape(1, c_out).astype(jnp.float32)
    fcw = jnp.pad(fc_w.T, ((0, 0), (0, out_pad - n_cls))).astype(jnp.float32)
    fcb = jnp.pad(fc_b.reshape(1, n_cls),
                  ((0, 0), (0, out_pad - n_cls))).astype(jnp.float32)

    itemsize = jnp.dtype(compute_dtype).itemsize
    if row_tile is None:
        row_tile = _pick_row_tile(p, kp, itemsize)
    assert p % row_tile == 0, "row_tile must divide H*W"
    r_steps = p // row_tile
    inv_p = 1.0 / float(p)

    kernel = functools.partial(fused_fbc_kernel, inv_p=inv_p)

    logits_pad = pl.pallas_call(
        kernel,
        out_shape=jax.ShapeDtypeStruct((n, 1, out_pad), jnp.float32),
        grid_spec=pltpu.PrefetchScalarGridSpec(
            num_scalar_prefetch=0,
            grid=(n, r_steps),
            in_specs=[
                pl.BlockSpec((1, row_tile, kp), lambda b, r: (b, r, 0)),
                pl.BlockSpec((kp, c_out), lambda b, r: (0, 0)),
                pl.BlockSpec((1, c_out), lambda b, r: (0, 0)),
                pl.BlockSpec((c_out, out_pad), lambda b, r: (0, 0)),
                pl.BlockSpec((1, out_pad), lambda b, r: (0, 0)),
            ],
            out_specs=pl.BlockSpec((1, 1, out_pad), lambda b, r: (b, 0, 0)),
            scratch_shapes=[pltpu.VMEM((1, c_out), jnp.float32)],
        ),
        compiler_params=pltpu.CompilerParams(
            dimension_semantics=("parallel", "arbitrary")),
    )(patches, w_t, b2d, fcw, fcb)

    return logits_pad[:, 0, :n_cls]


# ------------------------------ reference ----------------------------------

def fbc_reference(x_nchw, conv_w, conv_b, fc_w, fc_b):
    y = lax.conv_general_dilated(
        x_nchw, conv_w, window_strides=(1, 1), padding=((1, 1), (1, 1)),
        dimension_numbers=("NCHW", "OIHW", "NCHW"))
    y = jnp.maximum(y + conv_b.reshape(1, -1, 1, 1), 0.0)
    y = jnp.mean(y, axis=(2, 3))                          # global avg pool
    return y @ fc_w.T + fc_b


# --------------------------------- main -------------------------------------

if __name__ == "__main__":
    N, C_IN, H, W = 2, 4, 16, 16
    C_OUT, N_CLS = 32, 10

    key = jax.random.PRNGKey(0)
    kx, kw1, kb1, kw2, kb2 = jax.random.split(key, 5)

    x = jax.random.normal(kx, (N, C_IN, H, W), jnp.float32)
    conv_w = jax.random.normal(kw1, (C_OUT, C_IN, 3, 3), jnp.float32) * 0.1
    conv_b = jax.random.normal(kb1, (C_OUT,), jnp.float32) * 0.1
    fc_w = jax.random.normal(kw2, (N_CLS, C_OUT), jnp.float32) * 0.1
    fc_b = jax.random.normal(kb2, (N_CLS,), jnp.float32) * 0.1

    ref = fbc_reference(x, conv_w, conv_b, fc_w, fc_b)

    # 1) f32, auto-sized row tile (single reduction step at this toy shape).
    out = jax.block_until_ready(fbc_forward(x, conv_w, conv_b, fc_w, fc_b))
    assert out.shape == (N, N_CLS)
    assert jnp.allclose(out, ref, atol=1e-4, rtol=1e-4)

    # 2) f32, forced multi-step row reduction (exercises the accumulator/grid path).
    out2 = jax.block_until_ready(
        fbc_forward(x, conv_w, conv_b, fc_w, fc_b, row_tile=64))
    assert jnp.allclose(out2, ref, atol=1e-4, rtol=1e-4)

    # 3) bf16 MXU inputs (v6e/v7x fast path); f32 accumulation & elementwise math.
    out3 = jax.block_until_ready(
        fbc_forward(x, conv_w, conv_b, fc_w, fc_b, compute_dtype=jnp.bfloat16))
    assert jnp.allclose(out3, ref, atol=2e-2, rtol=2e-2)

    print("KERNEL_OK")
</pallas_src>

<mosaic_0001>
module attributes {stable_mosaic.version = 11 : i64} {
  func.func @fused_fbc_kernel(%arg0: i32, %arg1: i32, %arg2: memref<1x256x40xf32, #tpu.memory_space<vmem>>, %arg3: memref<40x32xf32, #tpu.memory_space<vmem>>, %arg4: memref<1x32xf32, #tpu.memory_space<vmem>>, %arg5: memref<32x128xf32, #tpu.memory_space<vmem>>, %arg6: memref<1x128xf32, #tpu.memory_space<vmem>>, %arg7: memref<1x1x128xf32, #tpu.memory_space<vmem>>, %arg8: memref<1x32xf32, #tpu.memory_space<vmem>>) attributes {dimension_semantics = [#tpu.dimension_semantics<parallel>, #tpu.dimension_semantics<arbitrary>], iteration_bounds = array<i64: 2, 1>, scalar_prefetch = 0 : i64, scratch_operands = 1 : i64, tpu.core_type = #tpu.core_type<tc>, window_params = [{transform_indices = @transform_0, window_bounds = array<i64: 1, 256, 40>}, {pipeline_mode = #tpu.pipeline_mode<synchronous>, transform_indices = @transform_1, window_bounds = array<i64: 40, 32>}, {pipeline_mode = #tpu.pipeline_mode<synchronous>, transform_indices = @transform_2, window_bounds = array<i64: 1, 32>}, {pipeline_mode = #tpu.pipeline_mode<synchronous>, transform_indices = @transform_3, window_bounds = array<i64: 32, 128>}, {pipeline_mode = #tpu.pipeline_mode<synchronous>, transform_indices = @transform_4, window_bounds = array<i64: 1, 128>}, {transform_indices = @transform_5, window_bounds = array<i64: 1, 1, 128>}]} {
    %c0_i32 = arith.constant 0 : i32
    %0 = arith.cmpi eq, %arg1, %c0_i32 : i32
    %1 = arith.extui %0 : i1 to i32
    %c0_i32_0 = arith.constant 0 : i32
    %2 = arith.cmpi ne, %1, %c0_i32_0 : i32
    scf.if %2 {
      %cst_16 = arith.constant 0.000000e+00 : f32
      %20 = vector.broadcast %cst_16 : f32 to vector<1x32xf32>
      %c0_17 = arith.constant 0 : index
      %c0_18 = arith.constant 0 : index
      %21 = vector.load %arg8[%c0_17, %c0_18] : memref<1x32xf32, #tpu.memory_space<vmem>>, vector<1x32xf32>
      tpu.vector_store %arg8[%c0_17, %c0_18], %20 {strides = array<i32>} : memref<1x32xf32, #tpu.memory_space<vmem>>, vector<1x32xf32>,
    } else {
    }
    %c0 = arith.constant 0 : index
    %c0_1 = arith.constant 0 : index
    %c0_2 = arith.constant 0 : index
    %3 = vector.load %arg2[%c0, %c0_1, %c0_2] : memref<1x256x40xf32, #tpu.memory_space<vmem>>, vector<1x256x40xf32>
    %4 = vector.shape_cast %3 : vector<1x256x40xf32> to vector<256x40xf32>
    %c0_3 = arith.constant 0 : index
    %c0_4 = arith.constant 0 : index
    %5 = vector.load %arg3[%c0_3, %c0_4] : memref<40x32xf32, #tpu.memory_space<vmem>>, vector<40x32xf32>
    %cst = arith.constant dense<0.000000e+00> : vector<256x32xf32>
    %6 = tpu.matmul %4, %5, %cst {dimension_numbers = #tpu.dot_dimension_numbers<[1], [0], [0], [1], [0, 0, 1, 1], [], []>} : vector<256x40xf32>, vector<40x32xf32>, vector<256x32xf32> -> vector<256x32xf32>
    %c0_5 = arith.constant 0 : index
    %c0_6 = arith.constant 0 : index
    %7 = vector.load %arg4[%c0_5, %c0_6] : memref<1x32xf32, #tpu.memory_space<vmem>>, vector<1x32xf32>
    %8 = vector.broadcast %7 : vector<1x32xf32> to vector<256x32xf32>
    %9 = arith.addf %6, %8 : vector<256x32xf32>
    %cst_7 = arith.constant 0.000000e+00 : f32
    %10 = vector.broadcast %cst_7 : f32 to vector<256x32xf32>
    %11 = arith.maximumf %9, %10 : vector<256x32xf32>
    %cst_8 = arith.constant 1.000000e+00 : f32
    %12 = vector.broadcast %cst_8 : f32 to vector<1x256xf32>
    %c0_9 = arith.constant 0 : index
    %c0_10 = arith.constant 0 : index
    %13 = vector.load %arg8[%c0_9, %c0_10] : memref<1x32xf32, #tpu.memory_space<vmem>>, vector<1x32xf32>
    %cst_11 = arith.constant dense<0.000000e+00> : vector<1x32xf32>
    %14 = tpu.matmul %12, %11, %cst_11 {dimension_numbers = #tpu.dot_dimension_numbers<[1], [0], [0], [1], [0, 0, 1, 1], [], []>} : vector<1x256xf32>, vector<256x32xf32>, vector<1x32xf32> -> vector<1x32xf32>
    %15 = arith.addf %13, %14 : vector<1x32xf32>
    %c0_12 = arith.constant 0 : index
    %c0_13 = arith.constant 0 : index
    %16 = vector.load %arg8[%c0_12, %c0_13] : memref<1x32xf32, #tpu.memory_space<vmem>>, vector<1x32xf32>
    tpu.vector_store %arg8[%c0_12, %c0_13], %15 {strides = array<i32>} : memref<1x32xf32, #tpu.memory_space<vmem>>, vector<1x32xf32>,
    %c0_i32_14 = arith.constant 0 : i32
    %17 = arith.cmpi eq, %arg1, %c0_i32_14 : i32
    %18 = arith.extui %17 : i1 to i32
    %c0_i32_15 = arith.constant 0 : i32
    %19 = arith.cmpi ne, %18, %c0_i32_15 : i32
    scf.if %19 {
      %c0_16 = arith.constant 0 : index
      %c0_17 = arith.constant 0 : index
      %20 = vector.load %arg8[%c0_16, %c0_17] : memref<1x32xf32, #tpu.memory_space<vmem>>, vector<1x32xf32>
      %cst_18 = arith.constant 3.906250e-03 : f32
      %21 = vector.broadcast %cst_18 : f32 to vector<1x32xf32>
      %22 = arith.mulf %20, %21 : vector<1x32xf32>
      %c0_19 = arith.constant 0 : index
      %c0_20 = arith.constant 0 : index
      %23 = vector.load %arg5[%c0_19, %c0_20] : memref<32x128xf32, #tpu.memory_space<vmem>>, vector<32x128xf32>
      %cst_21 = arith.constant dense<0.000000e+00> : vector<1x128xf32>
      %24 = tpu.matmul %22, %23, %cst_21 {dimension_numbers = #tpu.dot_dimension_numbers<[1], [0], [0], [1], [0, 0, 1, 1], [], []>} : vector<1x32xf32>, vector<32x128xf32>, vector<1x128xf32> -> vector<1x128xf32>
      %c0_22 = arith.constant 0 : index
      %c0_23 = arith.constant 0 : index
      %25 = vector.load %arg6[%c0_22, %c0_23] : memref<1x128xf32, #tpu.memory_space<vmem>>, vector<1x128xf32>
      %26 = arith.addf %24, %25 : vector<1x128xf32>
      %c0_24 = arith.constant 0 : index
      %c0_25 = arith.constant 0 : index
      %c0_26 = arith.constant 0 : index
      %27 = vector.load %arg7[%c0_24, %c0_25, %c0_26] : memref<1x1x128xf32, #tpu.memory_space<vmem>>, vector<1x1x128xf32>
      %28 = vector.shape_cast %27 : vector<1x1x128xf32> to vector<1x128xf32>
      %29 = vector.shape_cast %26 : vector<1x128xf32> to vector<1x1x128xf32>
      tpu.vector_store %arg7[%c0_24, %c0_25, %c0_26], %29 {strides = array<i32>} : memref<1x1x128xf32, #tpu.memory_space<vmem>>, vector<1x1x128xf32>,
    } else {
    }
    return
  }
  func.func @transform_0(%arg0: i32, %arg1: i32) -> (i32, i32, i32) {
    %c0_i32 = arith.constant 0 : i32
    %c0_i32_0 = arith.constant 0 : i32
    return %arg0, %arg1, %c0_i32 : i32, i32, i32
  }
  func.func @transform_1(%arg0: i32, %arg1: i32) -> (i32, i32) {
    %c0_i32 = arith.constant 0 : i32
    %c0_i32_0 = arith.constant 0 : i32
    %c0_i32_1 = arith.constant 0 : i32
    return %c0_i32, %c0_i32_0 : i32, i32
  }
  func.func @transform_2(%arg0: i32, %arg1: i32) -> (i32, i32) {
    %c0_i32 = arith.constant 0 : i32
    %c0_i32_0 = arith.constant 0 : i32
    %c0_i32_1 = arith.constant 0 : i32
    return %c0_i32, %c0_i32_0 : i32, i32
  }
  func.func @transform_3(%arg0: i32, %arg1: i32) -> (i32, i32) {
    %c0_i32 = arith.constant 0 : i32
    %c0_i32_0 = arith.constant 0 : i32
    %c0_i32_1 = arith.constant 0 : i32
    return %c0_i32, %c0_i32_0 : i32, i32
  }
  func.func @transform_4(%arg0: i32, %arg1: i32) -> (i32, i32) {
    %c0_i32 = arith.constant 0 : i32
    %c0_i32_0 = arith.constant 0 : i32
    %c0_i32_1 = arith.constant 0 : i32
    return %c0_i32, %c0_i32_0 : i32, i32
  }
  func.func @transform_5(%arg0: i32, %arg1: i32) -> (i32, i32, i32) {
    %c0_i32 = arith.constant 0 : i32
    %c0_i32_0 = arith.constant 0 : i32
    %c0_i32_1 = arith.constant 0 : i32
    return %arg0, %c0_i32, %c0_i32_0 : i32, i32, i32
  }
}

</mosaic_0001>

<bundles_post_ra>
// kernel: tpu_custom_call.1
= control target key start
LH: loop header
LB: loop body
LE: loop exit
PB: predicated region body
PF: predicated region fallthrough
CT: control target
= control target key end

     0   :  { %10 = vsyncpa [#allocation4], 0  ;;  %s1576_s0 = inlined_call_operand.vmem [shape: f32[2,256,40], index: 0, kind: input, shape index: {}]   ;;  %s1577_s1 = inlined_call_operand.vmem [shape: f32[40,32], index: 1, kind: input, shape index: {}]   ;;  %s1578_s2 = inlined_call_operand.vmem [shape: f32[1,32], index: 2, kind: input, shape index: {}]   ;;  %s1579_s3 = inlined_call_operand.vmem [shape: f32[32,128], index: 3, kind: input, shape index: {}]   ;;  %s1580_s4 = inlined_call_operand.vmem [shape: f32[1,128], index: 4, kind: input, shape index: {}]   ;;  %s1581_s5 = inlined_call_operand.hbm [shape: f32[2,1,128], index: 5, kind: output, shape index: {}]  }
   0x1   :  { %12 = vsyncpa [#allocation4 + $0x1], 0  ;;  %s1306_s18 = smov 0   ;;  %s1308_s19 = smov 0  }
   0x2   :  { %s1310_s20 = smov 0   ;;  %s1312_s21 = smov 0  }
   0x3   :  { %s1314_s22 = smov 0   ;;  %s1316_s23 = smov 0  }
   0x4 LB: > { %s895_s24 = sadd.s32 4294967295, %s1269_s23   ;;  %s896_s25 = sadd.s32 4294967294, %s1269_s23   ;;  %s1269_s23 = sphi %s1316_s23, %s18_s23   ;;  %s1265_s22 = sphi %s1314_s22, %s1588_s22   ;;  %s1261_s21 = sphi %s1312_s21, %s1587_s21   ;;  %s1257_s20 = sphi %s1310_s20, %s1586_s20   ;;  %s1253_s19 = sphi %s1308_s19, %s1585_s19   ;;  %s1249_s18 = sphi %s1306_s18, %s1584_s18  }
   0x5   : > { %s30_s26 = sadd.s32 1, %s1265_s22  ;;  %s149_s27 = sadd.s32 1, %s1257_s20 }
   0x6   : > { %p32_p0 = scmp.ge.s32.totalorder %s30_s26, 2  ;;  %p159_p1 = scmp.ne.s32.totalorder %s1257_s20, %s1253_s19 }
   0x7   : > { %p160_p2 = scmp.eq.s32.totalorder %s895_s24, 1  ;;  %p165_p3 = scmp.ne.s32.totalorder %s1253_s19, %s1249_s18 }
   0x8   : > { %s1590_s26 = smov (%p32_p0, %s30_s26), 0  ;;  %p166_p5 = scmp.eq.s32.totalorder %s896_s25, 1 }
   0x9   : > { %p1346_p4 = por %p160_p2, %p159_p1  ;;  %s146_s29 = ssub.s32 %s1265_s22, %s1590_s26 }
   0xa   : > { %p899_p6 = scmp.ge.s32.totalorder %s1269_s23, 1  ;;  %p147_p7 = scmp.eq.s32.totalorder %s146_s29, 0 }
   0xb   : > { %p1353_p8 = por %p166_p5, %p165_p3  ;;  %p209_p9 = scmp.lt.s32.totalorder %s1269_s23, 3 }
   0xc   : > { %s1359_s6 = scalar_select %p147_p7, %s1257_s20, %s149_s27  }
   0xd   : > { %p210_p10 = pnand %p899_p6, %p209_p9 }
   0xe   : > { %v288_v0 = vld [vmem:[%s1577_s1] sm:$0xff] (!%p210_p10)  ;;  %v289_v1 = vld [vmem:[%s1577_s1 + $0x8] sm:$0xff] (!%p210_p10)  ;;  %v290_v2 = vld [vmem:[%s1577_s1 + $0x10] sm:$0xff] (!%p210_p10)  ;;  %p241_p11 = scmp.lt.s32.totalorder (!%p210_p10), %s1261_s21, 1  ;;  %vm300_vm0 = vcmask (!%p210_p10), 326656   ;;  %v1271_v39 = vmov (!%p210_p10), 1.0  }
   0xf   : > { %213 = sbr.rel (%p210_p10) target bundleno = 766 (0x2fe), region = 40  ;;  %v1086_v3 = vpack.c.bf16 (!%p210_p10), %v289_v1, %v288_v0  ;;  %v291_v4 = vld [vmem:[%s1577_s1 + $0x18] sm:$0xff] (!%p210_p10)  ;;  %v292_v6 = vld [vmem:[%s1577_s1 + $0x20] sm:$0xff] (!%p210_p10)  ;;  %719 = vmatprep.mubr.f32.mxu1 (!%p210_p10), %v1271_v39  ;;  %vm254_vm1 = vcmask (!%p210_p10), 253952   ;;  %vm1274_vm2 = vmmov (!%p210_p10), 0   ;;  %vm738_vm3 = vcmask (!%p210_p10), 261120  }
  0x10   : > { %v1090_v5 = vpack.c.bf16 (!%p210_p10), %v291_v4, %v290_v2  ;;  %v1451_v40 = vld [vmem:[%s1578_s2] ss:$0 sm:$0xff] (!%p210_p10)  ;;  %s238_s17 = sand.u32 (!%p210_p10), 1, %s1253_s19   ;;  %s936_s27 = sshll.u32 (!%p210_p10), %s1261_s21, 4 }
  0x11   : > { %1087 = vmatprep.subr.bf16.mxu0 (!%p210_p10), %v1086_v3  ;;  %s239_s29 = scalar_lea.vmem (!%p210_p10), [#allocation3], %s238_s17  ;;  %s1529_s10 = scalar_lea.hbm (!%p210_p10), %s1581_s5, %s936_s27 }
  0x12   : > { %1089 = vmatpush3.bf16.msra.mxu0 (!%p210_p10), %v1086_v3  ;;  %s826_s7 = sshll.u32 (!%p210_p10), %s239_s29, 4  ;;  %s814_s11 = scalar_lea.sflag (!%p210_p10), [#allocation4], %s238_s17  ;;  %s1531_s7 = int_to_ptr.vmem [resolvable:$true] %s826_s7 }
  0x13   : > { %1091 = vmatprep.subr.bf16.mxu0 (!%p210_p10), %v1090_v5  ;;  %s1191_s12 = scalar_lea.vmem (!%p210_p10), %s1531_s7, 16 }
  0x14   : > { %p1192_p12 = scmp.ne.s32.totalorder (!%p210_p10), %s1531_s7, %s1191_s12 }
  0x16   : > { %s242_s15 = scalar_select %p241_p11, %s1261_s21, 1  ;;  %1093 = vmatpush3.bf16.msra.mxu0 %v1090_v5 }
  0x17   : > { %1025 = vmatprep.subr.mxu0 %v292_v6  ;;  %p1193_p13 = pnand %p1192_p12, %p1346_p4  ;;  %s1275_s21 = smov [#allocation3]  }
  0x18   : > { %s939_s16 = sshll.u32 %s242_s15, 8  ;;  %s1195_s13 = sshll.u32 %s1275_s21, 4  ;;  %s1196_s13 = int_to_ptr.vmem [resolvable:$false] %s1195_s13 }
  0x19   : > { %s1378_s25 = scalar_lea.vmem %s1576_s0, %s939_s16  ;;  %p1194_p0 = pneg %p1193_p13 }
  0x1a   : > { %v256_v7 = vld [vmem:[%s1378_s25] sm:$0xff]  ;;  %v257_v8 = vld [vmem:[%s1378_s25 + $0x8] sm:$0xff]  ;;  %v258_v9 = vld [vmem:[%s1378_s25 + $0x10] sm:$0xff]  ;;  %1026 = vmatpush3.msra.mxu0 %v292_v6  ;;  %s1197_s14 = scalar_lea.vmem %s1196_s13, 32  ;;  %p1198_p1 = scmp.lt.s32.totalorder %s1531_s7, %s1196_s13 }
  0x1b   : > { %1027 = vmatprep.mubr.msk.f32.mxu0 %vm300_vm0, %v256_v7  ;;  %v259_v10 = vld [vmem:[%s1378_s25 + $0x18] sm:$0xff]  ;;  %v260_v11 = vld [vmem:[%s1378_s25 + $0x20] sm:$0xff]  ;;  %v261_v12 = vld [vmem:[%s1378_s25 + $0x28] sm:$0xff]  ;;  %p1199_p2 = scmp.lt.s32.totalorder %s1197_s14, %s1191_s12 }
  0x1c   : > { %1028 = vmatmul.mubr.msk.f32.vlgmr.msra.gmra.mrb[0].mxu0 %vm300_vm0, %v257_v8  ;;  %v262_v13 = vld [vmem:[%s1378_s25 + $0x30] sm:$0xff]  ;;  %v263_v14 = vld [vmem:[%s1378_s25 + $0x38] sm:$0xff]  ;;  %v264_v15 = vld [vmem:[%s1378_s25 + $0x40] sm:$0xff] }
  0x1d   : > { %1030 = vmatprep.mubr.msk.f32.mxu0 %vm300_vm0, %v258_v9  ;;  %v265_v16 = vld [vmem:[%s1378_s25 + $0x48] sm:$0xff]  ;;  %v266_v17 = vld [vmem:[%s1378_s25 + $0x50] sm:$0xff]  ;;  %v267_v18 = vld [vmem:[%s1378_s25 + $0x58] sm:$0xff]  ;;  %p1200_p3 = por %p1199_p2, %p1198_p1 }
  0x1e   : > { %v268_v19 = vld [vmem:[%s1378_s25 + $0x60] sm:$0xff]  ;;  %v269_v20 = vld [vmem:[%s1378_s25 + $0x68] sm:$0xff]  ;;  %v270_v21 = vld [vmem:[%s1378_s25 + $0x70] sm:$0xff] }
  0x1f   : > { %v271_v22 = vld [vmem:[%s1378_s25 + $0x78] sm:$0xff]  ;;  %v272_v23 = vld [vmem:[%s1378_s25 + $0x80] sm:$0xff]  ;;  %v273_v24 = vld [vmem:[%s1378_s25 + $0x88] sm:$0xff]  ;;  %p1201_p5 = pnand %p1200_p3, %p1194_p0 }
  0x20   : > { %1031 = vmatmul.mubr.msk.f32.gmra.mrb[2].mxu0 %vm300_vm0, %v259_v10  ;;  %v274_v25 = vld [vmem:[%s1378_s25 + $0x90] sm:$0xff]  ;;  %v275_v26 = vld [vmem:[%s1378_s25 + $0x98] sm:$0xff]  ;;  %v276_v27 = vld [vmem:[%s1378_s25 + $0xa0] sm:$0xff] }
  0x21   : > { %1033 = vmatprep.mubr.msk.f32.mxu0 %vm300_vm0, %v260_v11  ;;  %v277_v28 = vld [vmem:[%s1378_s25 + $0xa8] sm:$0xff]  ;;  %v278_v29 = vld [vmem:[%s1378_s25 + $0xb0] sm:$0xff]  ;;  %v279_v30 = vld [vmem:[%s1378_s25 + $0xb8] sm:$0xff] }
  0x22   : > { %v280_v31 = vld [vmem:[%s1378_s25 + $0xc0] sm:$0xff]  ;;  %v281_v32 = vld [vmem:[%s1378_s25 + $0xc8] sm:$0xff]  ;;  %v282_v33 = vld [vmem:[%s1378_s25 + $0xd0] sm:$0xff] }
  0x23   : > { %v283_v34 = vld [vmem:[%s1378_s25 + $0xd8] sm:$0xff]  ;;  %v284_v35 = vld [vmem:[%s1378_s25 + $0xe0] sm:$0xff]  ;;  %v285_v36 = vld [vmem:[%s1378_s25 + $0xe8] sm:$0xff] }
  0x24   : > { %1034 = vmatmul.mubr.msk.f32.gmra.mrb[4].mxu0 %vm300_vm0, %v261_v12  ;;  %v286_v37 = vld [vmem:[%s1378_s25 + $0xf0] sm:$0xff]  ;;  %v287_v38 = vld [vmem:[%s1378_s25 + $0xf8] sm:$0xff] }
  0x25   : > { %1036 = vmatprep.mubr.msk.f32.mxu0 %vm300_vm0, %v262_v13 }
  0x28   : > { %1037 = vmatmul.mubr.msk.f32.gmra.mrb[6].mxu0 %vm300_vm0, %v263_v14 }
  0x29   : > { %1039 = vmatprep.mubr.msk.f32.mxu0 %vm300_vm0, %v264_v15 }
  0x2c   : > { %1040 = vmatmul.mubr.msk.f32.gmra.mrb[8].mxu0 %vm300_vm0, %v265_v16 }
  0x2d   : > { %1042 = vmatprep.mubr.msk.f32.mxu0 %vm300_vm0, %v266_v17 }
  0x30   : > { %1043 = vmatmul.mubr.msk.f32.gmra.mrb[10].mxu0 %vm300_vm0, %v267_v18 }
  0x31   : > { %1045 = vmatprep.mubr.msk.f32.mxu0 %vm300_vm0, %v268_v19 }
  0x34   : > { %1046 = vmatmul.mubr.msk.f32.gmra.mrb[12].mxu0 %vm300_vm0, %v269_v20 }
  0x35   : > { %1048 = vmatprep.mubr.msk.f32.mxu0 %vm300_vm0, %v270_v21 }
  0x38   : > { %1049 = vmatmul.mubr.msk.f32.gmra.mrb[14].mxu0 %vm300_vm0, %v271_v22 }
  0x39   : > { %1051 = vmatprep.mubr.msk.f32.mxu0 %vm300_vm0, %v272_v23 }
  0x3c   : > { %1052 = vmatmul.mubr.msk.f32.gmra.mrb[16].mxu0 %vm300_vm0, %v273_v24 }
  0x3d   : > { %1054 = vmatprep.mubr.msk.f32.mxu0 %vm300_vm0, %v274_v25 }
  0x40   : > { %1055 = vmatmul.mubr.msk.f32.gmra.mrb[18].mxu0 %vm300_vm0, %v275_v26 }
  0x41   : > { %1057 = vmatprep.mubr.msk.f32.mxu0 %vm300_vm0, %v276_v27 }
  0x44   : > { %1058 = vmatmul.mubr.msk.f32.gmra.mrb[20].mxu0 %vm300_vm0, %v277_v28 }
  0x45   : > { %1060 = vmatprep.mubr.msk.f32.mxu0 %vm300_vm0, %v278_v29 }
  0x48   : > { %1061 = vmatmul.mubr.msk.f32.gmra.mrb[22].mxu0 %vm300_vm0, %v279_v30 }
  0x49   : > { %1063 = vmatprep.mubr.msk.f32.mxu0 %vm300_vm0, %v280_v31 }
  0x4c   : > { %1064 = vmatmul.mubr.msk.f32.gmra.mrb[24].mxu0 %vm300_vm0, %v281_v32 }
  0x4d   : > { %1066 = vmatprep.mubr.msk.f32.mxu0 %vm300_vm0, %v282_v33 }
  0x50   : > { %1067 = vmatmul.mubr.msk.f32.gmra.mrb[26].mxu0 %vm300_vm0, %v283_v34 }
  0x51   : > { %1069 = vmatprep.mubr.msk.f32.mxu0 %vm300_vm0, %v284_v35 }
  0x54   : > { %1070 = vmatmul.mubr.msk.f32.gmra.mrb[28].mxu0 %vm300_vm0, %v285_v36 }
  0x55   : > { %1072 = vmatprep.mubr.msk.f32.mxu0 %vm300_vm0, %v286_v37 }
  0x58   : > { %1073 = vmatmul.mubr.msk.f32.gmra.mrb[30].mxu0 %vm300_vm0, %v287_v38 }
  0xef   : > { %v1029_v41 = vpop.f32.mrb[0].mxu0 }
  0xf0   : > { %v469_v42 = vadd.f32 %v1029_v41, %v1451_v40  ;;  %v463_v43 = vpop.f32.mrb[1].mxu0 }
  0xf1   : > { %v464_v44 = vadd.f32 %v1451_v40, %v463_v43 }
  0xf2   : > { %v623_v45 = vmax.f32 %v469_v42, 0.0 }
  0xf3   : > { %v622_v46 = vmax.f32 %v464_v44, 0.0  ;;  %v1032_v47 = vpop.f32.mrb[2].mxu0 }
  0xf4   : > { %v479_v48 = vadd.f32 %v1032_v47, %v1451_v40  ;;  %v473_v49 = vpop.f32.mrb[3].mxu0 }
  0xf5   : > { %v474_v50 = vadd.f32 %v1451_v40, %v473_v49  ;;  %v1096_v51 = vpack.c.bf16 %v623_v45, %v622_v46 }
  0xf6   : > { %v625_v52 = vmax.f32 %v479_v48, 0.0 }
  0xf7   : > { %v624_v53 = vmax.f32 %v474_v50, 0.0  ;;  %v1035_v54 = vpop.f32.mrb[4].mxu0 }
  0xf8   : > { %v489_v55 = vadd.f32 %v1035_v54, %v1451_v40  ;;  %v483_v56 = vpop.f32.mrb[5].mxu0 }
  0xf9   : > { %v1458_v57 = vpack.c.bf16 %v625_v52, %v624_v53  ;;  %v484_v58 = vadd.f32 %v1451_v40, %v483_v56 }
  0xfa   : > { %v627_v59 = vmax.f32 %v489_v55, 0.0 }
  0xfb   : > { %v626_v60 = vmax.f32 %v484_v58, 0.0  ;;  %v1038_v61 = vpop.f32.mrb[6].mxu0 }
  0xfc   : > { %v499_v62 = vadd.f32 %v1038_v61, %v1451_v40  ;;  %v493_v63 = vpop.f32.mrb[7].mxu0 }
  0xfd   : > { %v1462_v0 = vpack.c.bf16 %v627_v59, %v626_v60  ;;  %v494_v1 = vadd.f32 %v1451_v40, %v493_v63 }
  0xfe   : > { %v629_v2 = vmax.f32 %v499_v62, 0.0 }
  0xff   : > { %v628_v3 = vmax.f32 %v494_v1, 0.0  ;;  %v1041_v4 = vpop.f32.mrb[8].mxu0 }
 0x100   : > { %v509_v5 = vadd.f32 %v1041_v4, %v1451_v40  ;;  %v503_v6 = vpop.f32.mrb[9].mxu0 }
 0x101   : > { %v1466_v7 = vpack.c.bf16 %v629_v2, %v628_v3  ;;  %v504_v8 = vadd.f32 %v1451_v40, %v503_v6 }
 0x102   : > { %v631_v9 = vmax.f32 %v509_v5, 0.0 }
 0x103   : > { %v630_v10 = vmax.f32 %v504_v8, 0.0  ;;  %v1044_v11 = vpop.f32.mrb[10].mxu0 }
 0x104   : > { %v519_v12 = vadd.f32 %v1044_v11, %v1451_v40  ;;  %v513_v13 = vpop.f32.mrb[11].mxu0 }
 0x105   : > { %v1470_v14 = vpack.c.bf16 %v631_v9, %v630_v10  ;;  %v514_v15 = vadd.f32 %v1451_v40, %v513_v13 }
 0x106   : > { %v633_v16 = vmax.f32 %v519_v12, 0.0 }
 0x107   : > { %v632_v17 = vmax.f32 %v514_v15, 0.0  ;;  %v1047_v18 = vpop.f32.mrb[12].mxu0 }
 0x108   : > { %v529_v19 = vadd.f32 %v1047_v18, %v1451_v40  ;;  %v523_v20 = vpop.f32.mrb[13].mxu0 }
 0x109   : > { %v1474_v21 = vpack.c.bf16 %v633_v16, %v632_v17  ;;  %v524_v22 = vadd.f32 %v1451_v40, %v523_v20 }
 0x10a   : > { %v635_v23 = vmax.f32 %v529_v19, 0.0 }
 0x10b   : > { %v634_v24 = vmax.f32 %v524_v22, 0.0  ;;  %v1050_v25 = vpop.f32.mrb[14].mxu0 }
 0x10c   : > { %v539_v26 = vadd.f32 %v1050_v25, %v1451_v40  ;;  %v533_v27 = vpop.f32.mrb[15].mxu0 }
 0x10d   : > { %v1478_v28 = vpack.c.bf16 %v635_v23, %v634_v24  ;;  %v534_v29 = vadd.f32 %v1451_v40, %v533_v27 }
 0x10e   : > { %v637_v30 = vmax.f32 %v539_v26, 0.0 }
 0x10f   : > { %v636_v31 = vmax.f32 %v534_v29, 0.0  ;;  %v1053_v32 = vpop.f32.mrb[16].mxu0  ;;  %v1272_v29 = vmov 0.0  }
 0x110   : > { %v549_v33 = vadd.f32 %v1053_v32, %v1451_v40  ;;  %v543_v34 = vpop.f32.mrb[17].mxu0  ;;  %255 = vst.msk [vmem:[#allocation2] sm:$0x1] %vm254_vm1, %v1272_v29 }
 0x111   : > { %v1482_v35 = vpack.c.bf16 %v637_v30, %v636_v31  ;;  %v544_v36 = vadd.f32 %v1451_v40, %v543_v34  ;;  %v1273_v30 = vmov 0.0|0.0  }
 0x112   : > { %v639_v37 = vmax.f32 %v549_v33, 0.0 }
 0x113   : > { %v638_v38 = vmax.f32 %v544_v36, 0.0  ;;  %v1056_v41 = vpop.f32.mrb[18].mxu0 }
 0x114   : > { %v559_v42 = vadd.f32 %v1056_v41, %v1451_v40  ;;  %v553_v43 = vpop.f32.mrb[19].mxu0 }
 0x115   : > { %v554_v44 = vadd.f32 %v1451_v40, %v553_v43  ;;  %v1094_v45 = vpack.c.bf16 %v639_v37, %v638_v38 }
 0x116   : > { %v641_v46 = vmax.f32 %v559_v42, 0.0  ;;  %v737_v42 = vld [vmem:[%s1580_s4] sm:$0x1] }
 0x117   : > { %v640_v47 = vmax.f32 %v554_v44, 0.0  ;;  %v1059_v48 = vpop.f32.mrb[20].mxu0  ;;  %1095 = vmatprep.subr.bf16.mxu1 %v1094_v45  ;;  %v654_v34 = vld [vmem:[#allocation2] sm:$0x1] }
 0x118   : > { %v569_v49 = vadd.f32 %v1059_v48, %v1451_v40  ;;  %v563_v50 = vpop.f32.mrb[21].mxu0  ;;  %1097 = vmatpush3.bf16.msra.mxu1 %v1096_v51 }
 0x119   : > { %v1098_v52 = vpack.c.bf16 %v641_v46, %v640_v47  ;;  %v564_v53 = vadd.f32 %v1451_v40, %v563_v50 }
 0x11a   : > { %v643_v54 = vmax.f32 %v569_v49, 0.0 }
 0x11b   : > { %v642_v55 = vmax.f32 %v564_v53, 0.0  ;;  %v1062_v56 = vpop.f32.mrb[22].mxu0  ;;  %1099 = vmatprep.subr.bf16.mxu1 %v1098_v52 }
 0x11c   : > { %v579_v58 = vadd.f32 %v1062_v56, %v1451_v40  ;;  %v573_v59 = vpop.f32.mrb[23].mxu0  ;;  %1101 = vmatpush3.bf16.msra.mxu1 %v1458_v57 }
 0x11d   : > { %v1102_v60 = vpack.c.bf16 %v643_v54, %v642_v55  ;;  %v574_v61 = vadd.f32 %v1451_v40, %v573_v59 }
 0x11e   : > { %v645_v62 = vmax.f32 %v579_v58, 0.0 }
 0x11f   : > { %v644_v63 = vmax.f32 %v574_v61, 0.0  ;;  %v1065_v1 = vpop.f32.mrb[24].mxu0  ;;  %1103 = vmatprep.subr.bf16.mxu1 %v1102_v60 }
 0x120   : > { %v589_v51 = vadd.f32 %v1065_v1, %v1451_v40  ;;  %v583_v2 = vpop.f32.mrb[25].mxu0  ;;  %1105 = vmatpush3.bf16.msra.mxu1 %v1462_v0 }
 0x121   : > { %v1106_v3 = vpack.c.bf16 %v645_v62, %v644_v63  ;;  %v584_v4 = vadd.f32 %v1451_v40, %v583_v2 }
 0x122   : > { %v647_v5 = vmax.f32 %v589_v51, 0.0 }
 0x123   : > { %v646_v6 = vmax.f32 %v584_v4, 0.0  ;;  %v1068_v8 = vpop.f32.mrb[26].mxu0  ;;  %1107 = vmatprep.subr.bf16.mxu1 %v1106_v3 }
 0x124   : > { %v599_v57 = vadd.f32 %v1068_v8, %v1451_v40  ;;  %v593_v9 = vpop.f32.mrb[27].mxu0  ;;  %1109 = vmatpush3.bf16.msra.mxu1 %v1466_v7 }
 0x125   : > { %v1110_v10 = vpack.c.bf16 %v647_v5, %v646_v6  ;;  %v594_v11 = vadd.f32 %v1451_v40, %v593_v9 }
 0x126   : > { %v649_v12 = vmax.f32 %v599_v57, 0.0 }
 0x127   : > { %v648_v13 = vmax.f32 %v594_v11, 0.0  ;;  %v1071_v15 = vpop.f32.mrb[28].mxu0  ;;  %1111 = vmatprep.subr.bf16.mxu1 %v1110_v10 }
 0x128   : > { %v609_v0 = vadd.f32 %v1071_v15, %v1451_v40  ;;  %v603_v16 = vpop.f32.mrb[29].mxu0  ;;  %1113 = vmatpush3.bf16.msra.mxu1 %v1470_v14 }
 0x129   : > { %v1114_v17 = vpack.c.bf16 %v649_v12, %v648_v13  ;;  %v604_v18 = vadd.f32 %v1451_v40, %v603_v16 }
 0x12a   : > { %v651_v19 = vmax.f32 %v609_v0, 0.0 }
 0x12b   : > { %v650_v20 = vmax.f32 %v604_v18, 0.0  ;;  %v1074_v22 = vpop.f32.mrb[30].mxu0  ;;  %1115 = vmatprep.subr.bf16.mxu1 %v1114_v17 }
 0x12c   : > { %v619_v7 = vadd.f32 %v1074_v22, %v1451_v40  ;;  %v613_v23 = vpop.f32.mrb[31].mxu0  ;;  %1117 = vmatpush3.bf16.msra.mxu1 %v1474_v21  ;;  %v733_v21 = vld [vmem:[%s1579_s3] sm:$0xff] }
 0x12d   : > { %v1118_v24 = vpack.c.bf16 %v651_v19, %v650_v20  ;;  %v614_v25 = vadd.f32 %v1451_v40, %v613_v23  ;;  %v734_v40 = vld [vmem:[%s1579_s3 + $0x8] sm:$0xff] }
 0x12e   : > { %v653_v26 = vmax.f32 %v619_v7, 0.0  ;;  %v1127_v31 = vpack.c.bf16 %v734_v40, %v733_v21 }
 0x12f   : > { %v652_v27 = vmax.f32 %v614_v25, 0.0  ;;  %1119 = vmatprep.subr.bf16.mxu1 %v1118_v24 }
 0x130   : > { %1121 = vmatpush3.bf16.msra.mxu1 %v1478_v28  ;;  %v735_v28 = vld [vmem:[%s1579_s3 + $0x10] sm:$0xff] }
 0x131   : > { %v1122_v14 = vpack.c.bf16 %v653_v26, %v652_v27 }
 0x133   : > { %1123 = vmatprep.subr.bf16.mxu1 %v1122_v14 }
 0x134   : > { %1125 = vmatpush3.bf16.msra.mxu1 %v1482_v35 }
 0x135   : > { %1126 = vmatprep.subr.bf16.mxu1 %v1273_v30 }
 0x137   : > { %720 = vmatmul.mubr.f32.vlgmr.msra.gmra.mrb[0].mxu1 %v1271_v39  ;;  %v736_v39 = vld [vmem:[%s1579_s3 + $0x18] sm:$0xff] }
 0x138   : > { %1083 = vmatprep.mubr.msk.f32.mxu1 %vm1274_vm2, %v1272_v29  ;;  %1128 = vmatpush3.bf16.msra.mxu1 %v1127_v31  ;;  %v1130_v32 = vpack.c.bf16 %v736_v39, %v735_v28 }
 0x139   : > { %1129 = vmatprep.subr.bf16.mxu1 %v1273_v30 }
 0x13c   : > { %1131 = vmatpush3.bf16.msra.mxu1 %v1130_v32 }
 0x20a   : > { %v1009_v33 = vpop.f32.mrb[0].mxu1 }
 0x20b   : > { %v1010_v35 = vpop.f32.mrb[1].mxu1 }
 0x20c   : > { %v1011_v36 = vadd.f32 %v1010_v35, %v1009_v33 }
 0x20e   : > { %v725_v37 = vadd.f32 %v1011_v36, %v654_v34 }
 0x210   : > { %727 = vst.msk [vmem:[#allocation2] sm:$0x1] %vm254_vm1, %v725_v37 }
 0x217   : > { %v731_v38 = vld [vmem:[#allocation2] sm:$0x1] }
 0x218   : > { %v732_v41 = vmul.f32 0.00390625, %v731_v38 }
 0x21a   : > { %1084 = vmatmul.mubr.msk.f32.vlgmr.msra.gmra.mrb[2].mxu1 %vm738_vm3, %v732_v41 }
 0x2ed   : > { %v808_v43 = vpop.f32.mrb[2].mxu1 }
 0x2ee   : > { %v809_v44 = vadd.f32 %v808_v43, %v737_v42  ;;  %v1085_v45 = vpop.f32.mrb[3].mxu1 }
 0x2f0   : > { %812 = vst [vmem:[%s239_s29] sm:$0x1] %v809_v44 }
 0x2f1   : > { %1204 = shalt.err (!%p1201_p5)
}
 0x2f2   : > { %s1205_s15 = scalar_lea.hbm %s1529_s10, 16  ;;  %s1209_s24 = scalar_lea.hbm %s1581_s5, 32 }
 0x2f3   : > { %p1206_p6 = scmp.ne.s32.totalorder %s1529_s10, %s1205_s15  ;;  %p1210_p10 = scmp.lt.u32.totalorder %s1529_s10, %s1581_s5 }
 0x2f4   : > { %p1211_p11 = scmp.lt.u32.totalorder %s1209_s24, %s1205_s15  ;;  %p1213_p13 = scmp.lt.u32.totalorder %s1205_s15, %s1529_s10 }
 0x2f5   : > { %p1207_p7 = pnand %p1206_p6, %p1346_p4 }
 0x2f6   : > { %p1212_p12 = por %p1211_p11, %p1210_p10 }
 0x2f7   : > { %p1208_p9 = pneg %p1207_p7 }
 0x2f8   : > { %p1214_p0 = por %p1213_p13, %p1212_p12 }
 0x2fa   : > { %p1215_p1 = pnand %p1214_p0, %p1208_p9 }
 0x2fc   : > { %1218 = shalt.err (!%p1215_p1)
}
 0x2fd   : > { %1132 = dma.vmem_to_hbm [thread:$0]  (%p1346_p4), %s1531_s7, 16, %s1529_s10, %s814_s11  }
 0x2fe PF: > { %p1138_p2 = scmp.ge.s32.totalorder %s1269_s23, 2  ;;  %s838_s29 = sand.u32 1, %s1249_s18  }
 0x2ff   : > { %s839_s8 = scalar_lea.sflag [#allocation4], %s838_s29 }
 0x300   : > { %p1135_p3 = pnand %p1138_p2, %p1353_p8 }
 0x302   : > { %1244 = dma.done.wait (!%p1135_p3), %s839_s8, 16  }
 0x303   : > { %1246 = vsyncadd (!%p1135_p3), %s839_s8, 4294967280  ;;  %s18_s23 = sadd.s32 1, %s1269_s23   ;;  %s1584_s18 = smov %s1253_s19 }
 0x304   : > { %p15_p5 = scmp.ge.s32.totalorder %s18_s23, 4   ;;  %s1585_s19 = smov %s1257_s20 }
 0x305   : > { %s1586_s20 = smov %s1359_s6  ;;  %s1587_s21 = smov %s1265_s22 }
 0x306   : > { %s1588_s22 = smov %s1590_s26  ;;  %17 = sbr.rel (!%p15_p5) target bundleno = 4 (0x4), region = 83 }
 0x30d   :  { %843 = vsyncpa [#allocation4], 1 }
 0x30e   :  { %845 = vsyncpa [#allocation4 + $0x1], 1 }

</bundles_post_ra>
